<compile_context>
chip_gen: v6e
topology: v6e:2x2x1
jax: 0.10.0
libtpu: 0.0.40
codegen_flags: <defaults>
</compile_context>

<pallas_src>
import functools

import jax
import jax.numpy as jnp
from jax.experimental import pallas as pl
from jax.experimental.pallas import tpu as pltpu


def _round_up(x, m):
    return (x + m - 1) // m * m


def _pad2d(a, rows, cols):
    pr, pc = rows - a.shape[0], cols - a.shape[1]
    if pr == 0 and pc == 0:
        return a
    return jnp.pad(a, ((0, pr), (0, pc)))


def _vmem_capacity_bytes():
    try:
        cap = getattr(pltpu.get_tpu_info(), "vmem_capacity_bytes", None)
        if cap:
            return int(cap)
    except Exception:
        pass
    return 64 * 1024 * 1024  # conservative fallback (v7x per-TensorCore VMEM)


# ---------------------------------------------------------------------------
# Kernels
# ---------------------------------------------------------------------------

def ffn_resident_kernel(x_ref, w1_ref, b1_ref, w2_ref, b2_ref, o_ref):
    """Weights fully VMEM-resident; fused matmul-relu-matmul per token tile."""
    h = jnp.dot(x_ref[...], w1_ref[...], preferred_element_type=jnp.float32)
    h = jnp.maximum(h + b1_ref[...].astype(jnp.float32), 0.0)          # ReLU on the VPU
    y = jnp.dot(h.astype(w2_ref.dtype), w2_ref[...], preferred_element_type=jnp.float32)
    o_ref[...] = (y + b2_ref[...].astype(jnp.float32)).astype(o_ref.dtype)


def ffn_streamed_kernel_direct(x_ref, w1_ref, b1_ref, w2_ref, b2_ref, o_ref):
    """d_ffn-tiled reduction; accumulate directly into the resident f32 output block."""
    k = pl.program_id(1)
    h = jnp.dot(x_ref[...], w1_ref[...], preferred_element_type=jnp.float32)
    h = jnp.maximum(h + b1_ref[...].astype(jnp.float32), 0.0)
    part = jnp.dot(h.astype(w2_ref.dtype), w2_ref[...], preferred_element_type=jnp.float32)

    @pl.when(k == 0)
    def _():
        o_ref[...] = part + b2_ref[...].astype(jnp.float32)

    @pl.when(k != 0)
    def _():
        o_ref[...] = o_ref[...] + part


def ffn_streamed_kernel_acc(x_ref, w1_ref, b1_ref, w2_ref, b2_ref, o_ref, acc_ref):
    """d_ffn-tiled reduction with an f32 scratch accumulator (non-f32 outputs)."""
    k = pl.program_id(1)

    @pl.when(k == 0)
    def _():
        acc_ref[...] = jnp.zeros_like(acc_ref)

    h = jnp.dot(x_ref[...], w1_ref[...], preferred_element_type=jnp.float32)
    h = jnp.maximum(h + b1_ref[...].astype(jnp.float32), 0.0)
    acc_ref[...] += jnp.dot(h.astype(w2_ref.dtype), w2_ref[...],
                            preferred_element_type=jnp.float32)

    @pl.when(k == pl.num_programs(1) - 1)
    def _():
        o_ref[...] = (acc_ref[...] + b2_ref[...].astype(jnp.float32)).astype(o_ref.dtype)


# ---------------------------------------------------------------------------
# Wrapper
# ---------------------------------------------------------------------------

@functools.partial(jax.jit,
                   static_argnames=("tm", "tk", "compute_dtype", "weights_resident"))
def position_wise_ffn(x, w1, b1, w2, b2, *, tm=512, tk=512,
                      compute_dtype=None, weights_resident=None):
    """x: [B, S, d_model] -> [B, S, d_model] (eval-mode dropout == identity)."""
    B, S, d_model = x.shape
    d_ffn = w1.shape[1]
    N = B * S
    out_dtype = x.dtype

    # Optional low-precision operand path (e.g. jnp.bfloat16); f32 accumulation is
    # kept inside the kernels regardless of operand dtype.
    if compute_dtype is not None:
        x = x.astype(compute_dtype)
        w1, b1, w2, b2 = (a.astype(compute_dtype) for a in (w1, b1, w2, b2))

    x_itemsize = jnp.dtype(x.dtype).itemsize
    w_itemsize = jnp.dtype(w1.dtype).itemsize
    out_itemsize = jnp.dtype(out_dtype).itemsize

    d_model_p = _round_up(d_model, 128)
    d_ffn_128 = _round_up(d_ffn, 128)

    # Token tile: large to amortize weight streaming / per-step overhead, clamped for
    # small N, then split so the "parallel" grid axis has >= 2 tiles whenever possible
    # (v7x has two TensorCores).
    tm_eff = min(tm, _round_up(N, 8))
    if _round_up(N, tm_eff) == tm_eff and tm_eff > 8:
        tm_eff = max(8, _round_up(tm_eff // 2, 8))

    # Per-generation VMEM budgets derived from the chip (128 MiB on v5e/v6e, 64 on v7x).
    vmem_cap = _vmem_capacity_bytes()
    big_vmem = vmem_cap >= 100 * 1024 * 1024
    resident_budget = int((0.70 if big_vmem else 0.50) * vmem_cap)
    streamed_budget = int(0.60 * vmem_cap)
    vmem_limit = int(0.70 * vmem_cap)

    resident_bytes = (
        2 * d_model_p * d_ffn_128 * w_itemsize          # W1 + W2 (resident)
        + (d_ffn_128 + d_model_p) * w_itemsize          # b1 + b2
        + 2 * tm_eff * d_model_p * x_itemsize           # x tile, double-buffered
        + 2 * tm_eff * d_model_p * out_itemsize         # out tile, double-buffered
        + tm_eff * d_ffn_128 * 4                        # f32 intermediate h
    )
    use_resident = (resident_bytes <= resident_budget if weights_resident is None
                    else weights_resident)

    if use_resident:
        d_ffn_p = d_ffn_128
        n_p = _round_up(N, tm_eff)
        grid = (n_p // tm_eff,)
        kernel = ffn_resident_kernel
        in_specs = [
            pl.BlockSpec((tm_eff, d_model_p), lambda i: (i, 0)),      # x tile
            pl.BlockSpec((d_model_p, d_ffn_p), lambda i: (0, 0)),     # W1 (resident)
            pl.BlockSpec((1, d_ffn_p), lambda i: (0, 0)),             # b1 (resident)
            pl.BlockSpec((d_ffn_p, d_model_p), lambda i: (0, 0)),     # W2 (resident)
            pl.BlockSpec((1, d_model_p), lambda i: (0, 0)),           # b2 (resident)
        ]
        out_specs = pl.BlockSpec((tm_eff, d_model_p), lambda i: (i, 0))
        scratch_shapes = []
        dim_sem = ("parallel",)
        weight_bytes = (w1.size + b1.size + w2.size + b2.size) * w_itemsize
    else:
        tk_eff = min(tk, d_ffn_128)

        def streamed_bytes(tm_, tk_):
            return (2 * tm_ * d_model_p * x_itemsize                              # x
                    + 2 * (d_model_p * tk_ + tk_ * d_model_p + tk_) * w_itemsize  # W1/b1/W2
                    + d_model_p * w_itemsize                                      # b2
                    + 2 * tm_ * d_model_p * out_itemsize                          # out
                    + tm_ * d_model_p * 4                                         # f32 accum
                    + tm_ * tk_ * 4)                                              # h

        while (streamed_bytes(tm_eff, tk_eff) > streamed_budget
               and (tm_eff > 8 or tk_eff > 128)):
            if tk_eff > 128:
                tk_eff = max(128, _round_up(tk_eff // 2, 128))
            else:
                tm_eff = max(8, _round_up(tm_eff // 2, 8))

        d_ffn_p = _round_up(d_ffn, tk_eff)
        n_p = _round_up(N, tm_eff)
        grid = (n_p // tm_eff, d_ffn_p // tk_eff)
        in_specs = [
            pl.BlockSpec((tm_eff, d_model_p), lambda i, k: (i, 0)),   # x tile (resident over k)
            pl.BlockSpec((d_model_p, tk_eff), lambda i, k: (0, k)),   # W1 column block
            pl.BlockSpec((1, tk_eff), lambda i, k: (0, k)),           # b1 block
            pl.BlockSpec((tk_eff, d_model_p), lambda i, k: (k, 0)),   # W2 row block
            pl.BlockSpec((1, d_model_p), lambda i, k: (0, 0)),        # b2
        ]
        out_specs = pl.BlockSpec((tm_eff, d_model_p), lambda i, k: (i, 0))
        dim_sem = ("parallel", "arbitrary")
        if jnp.dtype(out_dtype) == jnp.float32:
            kernel = ffn_streamed_kernel_direct
            scratch_shapes = []
        else:
            kernel = ffn_streamed_kernel_acc
            scratch_shapes = [pltpu.VMEM((tm_eff, d_model_p), jnp.float32)]
        # W1/b1/W2 are re-streamed from HBM once per token tile.
        weight_bytes = ((w1.size + b1.size + w2.size) * w_itemsize * (n_p // tm_eff)
                        + b2.size * w_itemsize)

    # Zero-pad to tile boundaries (no-op when already aligned; exact for this FFN).
    x_p = _pad2d(x.reshape(N, d_model), n_p, d_model_p)
    w1_p = _pad2d(w1, d_model_p, d_ffn_p)
    b1_p = _pad2d(b1, 1, d_ffn_p)
    w2_p = _pad2d(w2, d_ffn_p, d_model_p)
    b2_p = _pad2d(b2, 1, d_model_p)

    cost = pl.CostEstimate(
        flops=4 * N * d_model * d_ffn,                  # two matmuls, 2 flops / MAC
        transcendentals=0,
        bytes_accessed=N * d_model * (x_itemsize + out_itemsize) + weight_bytes,
    )

    out = pl.pallas_call(
        kernel,
        out_shape=jax.ShapeDtypeStruct((n_p, d_model_p), out_dtype),
        grid_spec=pltpu.PrefetchScalarGridSpec(
            num_scalar_prefetch=0,
            grid=grid,
            in_specs=in_specs,
            out_specs=out_specs,
            scratch_shapes=scratch_shapes,
        ),
        compiler_params=pltpu.CompilerParams(
            dimension_semantics=dim_sem,
            vmem_limit_bytes=vmem_limit,
        ),
        cost_estimate=cost,
    )(x_p, w1_p, b1_p, w2_p, b2_p)

    return out[:N, :d_model].reshape(B, S, d_model)


def init_params(key, d_model, d_ffn, dtype=jnp.float32):
    """Deterministic init mimicking nn.Linear's uniform(-1/sqrt(fan_in), 1/sqrt(fan_in))."""
    k1, k2, k3, k4 = jax.random.split(key, 4)
    bound1 = 1.0 / jnp.sqrt(d_model)
    bound2 = 1.0 / jnp.sqrt(d_ffn)
    w1 = jax.random.uniform(k1, (d_model, d_ffn), dtype, -bound1, bound1)
    b1 = jax.random.uniform(k2, (1, d_ffn), dtype, -bound1, bound1)
    w2 = jax.random.uniform(k3, (d_ffn, d_model), dtype, -bound2, bound2)
    b2 = jax.random.uniform(k4, (1, d_model), dtype, -bound2, bound2)
    return w1, b1, w2, b2


if __name__ == "__main__":
    key = jax.random.PRNGKey(0)
    kx, kp = jax.random.split(key)

    B, S, d_model, d_ffn = 2, 8, 32, 64          # small shapes consistent with the module
    x = jax.random.normal(kx, (B, S, d_model), jnp.float32)
    w1, b1, w2, b2 = init_params(kp, d_model, d_ffn)

    # Pure-JAX reference (eval-mode dropout == identity).
    ref = jnp.maximum(x @ w1 + b1, 0.0) @ w2 + b2

    # Auto path (weights-resident fast path for these tiny shapes).
    y = jax.block_until_ready(position_wise_ffn(x, w1, b1, w2, b2))
    assert y.shape == (B, S, d_model)
    assert jnp.allclose(y, ref, atol=1e-5, rtol=1e-5)

    # Force the streamed (d_ffn-tiled) path as well so both kernels are exercised.
    y_s = jax.block_until_ready(
        position_wise_ffn(x, w1, b1, w2, b2, weights_resident=False))
    assert jnp.allclose(y_s, ref, atol=1e-5, rtol=1e-5)

    print("KERNEL_OK")
</pallas_src>

<mosaic_0001>
module attributes {stable_mosaic.version = 11 : i64} {
  func.func @ffn_resident_kernel(%arg0: i32, %arg1: memref<8x128xf32, #tpu.memory_space<vmem>>, %arg2: memref<128x128xf32, #tpu.memory_space<vmem>>, %arg3: memref<1x128xf32, #tpu.memory_space<vmem>>, %arg4: memref<128x128xf32, #tpu.memory_space<vmem>>, %arg5: memref<1x128xf32, #tpu.memory_space<vmem>>, %arg6: memref<8x128xf32, #tpu.memory_space<vmem>>) attributes {dimension_semantics = [#tpu.dimension_semantics<parallel>], iteration_bounds = array<i64: 2>, scalar_prefetch = 0 : i64, scratch_operands = 0 : i64, tpu.core_type = #tpu.core_type<tc>, window_params = [{transform_indices = @transform_0, window_bounds = array<i64: 8, 128>}, {pipeline_mode = #tpu.pipeline_mode<synchronous>, transform_indices = @transform_1, window_bounds = array<i64: 128, 128>}, {pipeline_mode = #tpu.pipeline_mode<synchronous>, transform_indices = @transform_2, window_bounds = array<i64: 1, 128>}, {pipeline_mode = #tpu.pipeline_mode<synchronous>, transform_indices = @transform_3, window_bounds = array<i64: 128, 128>}, {pipeline_mode = #tpu.pipeline_mode<synchronous>, transform_indices = @transform_4, window_bounds = array<i64: 1, 128>}, {transform_indices = @transform_5, window_bounds = array<i64: 8, 128>}]} {
    %c0 = arith.constant 0 : index
    %c0_0 = arith.constant 0 : index
    %0 = vector.load %arg1[%c0, %c0_0] : memref<8x128xf32, #tpu.memory_space<vmem>>, vector<8x128xf32>
    %c0_1 = arith.constant 0 : index
    %c0_2 = arith.constant 0 : index
    %1 = vector.load %arg2[%c0_1, %c0_2] : memref<128x128xf32, #tpu.memory_space<vmem>>, vector<128x128xf32>
    %cst = arith.constant dense<0.000000e+00> : vector<8x128xf32>
    %2 = tpu.matmul %0, %1, %cst {dimension_numbers = #tpu.dot_dimension_numbers<[1], [0], [0], [1], [0, 0, 1, 1], [], []>} : vector<8x128xf32>, vector<128x128xf32>, vector<8x128xf32> -> vector<8x128xf32>
    %c0_3 = arith.constant 0 : index
    %c0_4 = arith.constant 0 : index
    %3 = vector.load %arg3[%c0_3, %c0_4] : memref<1x128xf32, #tpu.memory_space<vmem>>, vector<1x128xf32>
    %4 = vector.broadcast %3 : vector<1x128xf32> to vector<8x128xf32>
    %5 = arith.addf %2, %4 : vector<8x128xf32>
    %cst_5 = arith.constant 0.000000e+00 : f32
    %6 = vector.broadcast %cst_5 : f32 to vector<8x128xf32>
    %7 = arith.maximumf %5, %6 : vector<8x128xf32>
    %c0_6 = arith.constant 0 : index
    %c0_7 = arith.constant 0 : index
    %8 = vector.load %arg4[%c0_6, %c0_7] : memref<128x128xf32, #tpu.memory_space<vmem>>, vector<128x128xf32>
    %cst_8 = arith.constant dense<0.000000e+00> : vector<8x128xf32>
    %9 = tpu.matmul %7, %8, %cst_8 {dimension_numbers = #tpu.dot_dimension_numbers<[1], [0], [0], [1], [0, 0, 1, 1], [], []>} : vector<8x128xf32>, vector<128x128xf32>, vector<8x128xf32> -> vector<8x128xf32>
    %c0_9 = arith.constant 0 : index
    %c0_10 = arith.constant 0 : index
    %10 = vector.load %arg5[%c0_9, %c0_10] : memref<1x128xf32, #tpu.memory_space<vmem>>, vector<1x128xf32>
    %11 = vector.broadcast %10 : vector<1x128xf32> to vector<8x128xf32>
    %12 = arith.addf %9, %11 : vector<8x128xf32>
    %c0_11 = arith.constant 0 : index
    %c0_12 = arith.constant 0 : index
    %13 = vector.load %arg6[%c0_11, %c0_12] : memref<8x128xf32, #tpu.memory_space<vmem>>, vector<8x128xf32>
    tpu.vector_store %arg6[%c0_11, %c0_12], %12 {strides = array<i32>} : memref<8x128xf32, #tpu.memory_space<vmem>>, vector<8x128xf32>,
    return
  }
  func.func @transform_0(%arg0: i32) -> (i32, i32) {
    %c0_i32 = arith.constant 0 : i32
    %c0_i32_0 = arith.constant 0 : i32
    return %arg0, %c0_i32 : i32, i32
  }
  func.func @transform_1(%arg0: i32) -> (i32, i32) {
    %c0_i32 = arith.constant 0 : i32
    %c0_i32_0 = arith.constant 0 : i32
    %c0_i32_1 = arith.constant 0 : i32
    return %c0_i32, %c0_i32_0 : i32, i32
  }
  func.func @transform_2(%arg0: i32) -> (i32, i32) {
    %c0_i32 = arith.constant 0 : i32
    %c0_i32_0 = arith.constant 0 : i32
    %c0_i32_1 = arith.constant 0 : i32
    return %c0_i32, %c0_i32_0 : i32, i32
  }
  func.func @transform_3(%arg0: i32) -> (i32, i32) {
    %c0_i32 = arith.constant 0 : i32
    %c0_i32_0 = arith.constant 0 : i32
    %c0_i32_1 = arith.constant 0 : i32
    return %c0_i32, %c0_i32_0 : i32, i32
  }
  func.func @transform_4(%arg0: i32) -> (i32, i32) {
    %c0_i32 = arith.constant 0 : i32
    %c0_i32_0 = arith.constant 0 : i32
    %c0_i32_1 = arith.constant 0 : i32
    return %c0_i32, %c0_i32_0 : i32, i32
  }
  func.func @transform_5(%arg0: i32) -> (i32, i32) {
    %c0_i32 = arith.constant 0 : i32
    %c0_i32_0 = arith.constant 0 : i32
    return %arg0, %c0_i32 : i32, i32
  }
}

</mosaic_0001>

<bundles_post_ra>
// kernel: position_wise_ffn.1
= control target key start
LH: loop header
LB: loop body
LE: loop exit
PB: predicated region body
PF: predicated region fallthrough
CT: control target
= control target key end

     0   :  { %s627_s18 = smov 0   ;;  %s791_s0 = inlined_call_operand.vmem [shape: f32[16,128], index: 0, kind: input, shape index: {}]   ;;  %s792_s1 = inlined_call_operand.vmem [shape: f32[128,128], index: 1, kind: input, shape index: {}]   ;;  %s793_s2 = inlined_call_operand.vmem [shape: f32[1,128], index: 2, kind: input, shape index: {}]   ;;  %s794_s3 = inlined_call_operand.vmem [shape: f32[128,128], index: 3, kind: input, shape index: {}]   ;;  %s795_s4 = inlined_call_operand.vmem [shape: f32[1,128], index: 4, kind: input, shape index: {}]   ;;  %s796_s5 = inlined_call_operand.vmem [shape: f32[16,128], index: 5, kind: output, shape index: {}]  }
   0x1 LB: > { %s462_s19 = sadd.s32 4294967295, %s593_s18   ;;  %p466_p0 = scmp.ge.s32.totalorder %s593_s18, 1  ;;  %s593_s18 = sphi %s627_s18, %s15_s18  }
   0x2   : > { %p186_p1 = scmp.lt.s32.totalorder %s593_s18, 3 }
   0x4   : > { %p187_p2 = pnand %p466_p0, %p186_p1 }
   0x5   : > { %p212_p3 = scmp.lt.s32.totalorder (!%p187_p2), %s462_s19, 1 }
   0x6   : > { %190 = sbr.rel (%p187_p2) target bundleno = 437 (0x1b5), region = 40 }
   0xb   : > { %v236_v0 = vld [vmem:[%s792_s1 + $0x78] sm:$0xff]  ;;  %v595_v1 = vmov 0.0   ;;  %v235_v2 = vld [vmem:[%s792_s1 + $0x70] sm:$0xff]  ;;  %vm596_vm0 = vmmov 0   ;;  %v234_v3 = vld [vmem:[%s792_s1 + $0x68] sm:$0xff]  ;;  %s798_s19 = smov (!%p212_p3, %s462_s19), 1 }
   0xc   : > { %507 = vmatprep.subr.mxu0 %v595_v1  ;;  %539 = vmatprep.mubr.msk.f32.mxu0 %vm596_vm0, %v595_v1  ;;  %v233_v4 = vld [vmem:[%s792_s1 + $0x60] sm:$0xff]  ;;  %v330_v5 = vld [vmem:[%s794_s3 + $0x78] sm:$0xff]  ;;  %v329_v6 = vld [vmem:[%s794_s3 + $0x70] sm:$0xff]  ;;  %s467_s22 = sshll.u32 %s798_s19, 3 }
   0xd   : > { %508 = vmatpush3.msra.mxu0 %v236_v0  ;;  %542 = vmatprep.subr.mxu1 %v595_v1  ;;  %v232_v7 = vld [vmem:[%s792_s1 + $0x58] sm:$0xff]  ;;  %v328_v8 = vld [vmem:[%s794_s3 + $0x68] sm:$0xff]  ;;  %v231_v9 = vld [vmem:[%s792_s1 + $0x50] sm:$0xff]  ;;  %s215_s6 = scalar_lea.vmem %s791_s0, %s467_s22  ;;  %s219_s26 = scalar_lea.vmem %s796_s5, %s467_s22 }
   0xe   : > { %509 = vmatprep.subr.mxu0 %v595_v1  ;;  %574 = vmatprep.mubr.msk.f32.mxu1 %vm596_vm0, %v595_v1  ;;  %v327_v10 = vld [vmem:[%s794_s3 + $0x60] sm:$0xff]  ;;  %v230_v11 = vld [vmem:[%s792_s1 + $0x48] sm:$0xff]  ;;  %v326_v12 = vld [vmem:[%s794_s3 + $0x58] sm:$0xff] }
   0xf   : > { %510 = vmatpush3.msra.mxu0 %v235_v2  ;;  %543 = vmatpush3.msra.mxu1 %v330_v5  ;;  %v229_v13 = vld [vmem:[%s792_s1 + $0x40] sm:$0xff]  ;;  %v325_v14 = vld [vmem:[%s794_s3 + $0x50] sm:$0xff]  ;;  %v228_v15 = vld [vmem:[%s792_s1 + $0x38] sm:$0xff] }
  0x10   : > { %511 = vmatprep.subr.mxu0 %v595_v1  ;;  %544 = vmatprep.subr.mxu1 %v595_v1  ;;  %v324_v16 = vld [vmem:[%s794_s3 + $0x48] sm:$0xff]  ;;  %v227_v17 = vld [vmem:[%s792_s1 + $0x30] sm:$0xff]  ;;  %v323_v18 = vld [vmem:[%s794_s3 + $0x40] sm:$0xff] }
  0x11   : > { %512 = vmatpush3.msra.mxu0 %v234_v3  ;;  %545 = vmatpush3.msra.mxu1 %v329_v6  ;;  %v226_v19 = vld [vmem:[%s792_s1 + $0x28] sm:$0xff]  ;;  %v322_v20 = vld [vmem:[%s794_s3 + $0x38] sm:$0xff]  ;;  %v225_v21 = vld [vmem:[%s792_s1 + $0x20] sm:$0xff] }
  0x12   : > { %513 = vmatprep.subr.mxu0 %v595_v1  ;;  %546 = vmatprep.subr.mxu1 %v595_v1  ;;  %v321_v22 = vld [vmem:[%s794_s3 + $0x30] sm:$0xff]  ;;  %v224_v23 = vld [vmem:[%s792_s1 + $0x18] sm:$0xff]  ;;  %v320_v24 = vld [vmem:[%s794_s3 + $0x28] sm:$0xff] }
  0x13   : > { %514 = vmatpush3.msra.mxu0 %v233_v4  ;;  %547 = vmatpush3.msra.mxu1 %v328_v8  ;;  %v223_v25 = vld [vmem:[%s792_s1 + $0x10] sm:$0xff]  ;;  %v319_v26 = vld [vmem:[%s794_s3 + $0x20] sm:$0xff]  ;;  %v222_v27 = vld [vmem:[%s792_s1 + $0x8] sm:$0xff] }
  0x14   : > { %515 = vmatprep.subr.mxu0 %v595_v1  ;;  %548 = vmatprep.subr.mxu1 %v595_v1  ;;  %v318_v28 = vld [vmem:[%s794_s3 + $0x18] sm:$0xff]  ;;  %v221_v29 = vld [vmem:[%s792_s1] sm:$0xff]  ;;  %v317_v31 = vld [vmem:[%s794_s3 + $0x10] sm:$0xff] }
  0x15   : > { %516 = vmatpush3.msra.mxu0 %v232_v7  ;;  %549 = vmatpush3.msra.mxu1 %v327_v10  ;;  %v220_v30 = vld [vmem:[%s215_s6] sm:$0xff]  ;;  %v316_v32 = vld [vmem:[%s794_s3 + $0x8] sm:$0xff] }
  0x16   : > { %517 = vmatprep.subr.mxu0 %v595_v1  ;;  %550 = vmatprep.subr.mxu1 %v595_v1  ;;  %v315_v33 = vld [vmem:[%s794_s3] sm:$0xff] }
  0x17   : > { %518 = vmatpush3.msra.mxu0 %v231_v9  ;;  %551 = vmatpush3.msra.mxu1 %v326_v12  ;;  %v469_v34 = vld [vmem:[%s793_s2] ss:$0 sm:$0xff] }
  0x18   : > { %519 = vmatprep.subr.mxu0 %v595_v1  ;;  %552 = vmatprep.subr.mxu1 %v595_v1  ;;  %v470_v39 = vld [vmem:[%s795_s4] ss:$0 sm:$0xff] }
  0x19   : > { %520 = vmatpush3.msra.mxu0 %v230_v11  ;;  %553 = vmatpush3.msra.mxu1 %v325_v14 }
  0x1a   : > { %521 = vmatprep.subr.mxu0 %v595_v1  ;;  %554 = vmatprep.subr.mxu1 %v595_v1 }
  0x1b   : > { %522 = vmatpush3.msra.mxu0 %v229_v13  ;;  %555 = vmatpush3.msra.mxu1 %v324_v16 }
  0x1c   : > { %523 = vmatprep.subr.mxu0 %v595_v1  ;;  %556 = vmatprep.subr.mxu1 %v595_v1 }
  0x1d   : > { %524 = vmatpush3.msra.mxu0 %v228_v15  ;;  %557 = vmatpush3.msra.mxu1 %v323_v18 }
  0x1e   : > { %525 = vmatprep.subr.mxu0 %v595_v1  ;;  %558 = vmatprep.subr.mxu1 %v595_v1 }
  0x1f   : > { %526 = vmatpush3.msra.mxu0 %v227_v17  ;;  %559 = vmatpush3.msra.mxu1 %v322_v20 }
  0x20   : > { %527 = vmatprep.subr.mxu0 %v595_v1  ;;  %560 = vmatprep.subr.mxu1 %v595_v1 }
  0x21   : > { %528 = vmatpush3.msra.mxu0 %v226_v19  ;;  %561 = vmatpush3.msra.mxu1 %v321_v22 }
  0x22   : > { %529 = vmatprep.subr.mxu0 %v595_v1  ;;  %562 = vmatprep.subr.mxu1 %v595_v1 }
  0x23   : > { %530 = vmatpush3.msra.mxu0 %v225_v21  ;;  %563 = vmatpush3.msra.mxu1 %v320_v24 }
  0x24   : > { %531 = vmatprep.subr.mxu0 %v595_v1  ;;  %564 = vmatprep.subr.mxu1 %v595_v1 }
  0x25   : > { %532 = vmatpush3.msra.mxu0 %v224_v23  ;;  %565 = vmatpush3.msra.mxu1 %v319_v26 }
  0x26   : > { %533 = vmatprep.subr.mxu0 %v595_v1  ;;  %566 = vmatprep.subr.mxu1 %v595_v1 }
  0x27   : > { %534 = vmatpush3.msra.mxu0 %v223_v25  ;;  %567 = vmatpush3.msra.mxu1 %v318_v28 }
  0x28   : > { %535 = vmatprep.subr.mxu0 %v595_v1  ;;  %568 = vmatprep.subr.mxu1 %v595_v1 }
  0x29   : > { %536 = vmatpush3.msra.mxu0 %v222_v27  ;;  %569 = vmatpush3.msra.mxu1 %v317_v31 }
  0x2a   : > { %537 = vmatprep.subr.mxu0 %v595_v1  ;;  %570 = vmatprep.subr.mxu1 %v595_v1 }
  0x2b   : > { %538 = vmatpush3.msra.mxu0 %v221_v29  ;;  %571 = vmatpush3.msra.mxu1 %v316_v32 }
  0x2c   : > { %540 = vmatmul.mubr.f32.vlgmr.msra.gmra.mxu0 %v220_v30  ;;  %572 = vmatprep.subr.mxu1 %v595_v1 }
  0x2d   : > { %573 = vmatpush3.msra.mxu1 %v315_v33 }
  0xec   : > { %v310_v35 = vpop.f32.mrf.mxu0 }
  0xed   : > { %v311_v36 = vadd.f32 %v469_v34, %v310_v35 }
  0xee   : > { %v541_v37 = vpop.f32.mrf.mxu0 }
  0xef   : > { %v314_v38 = vmax.f32 %v311_v36, 0.0 }
  0xf1   : > { %575 = vmatmul.mubr.f32.vlgmr.msra.gmra.mxu1 %v314_v38 }
 0x1b1   : > { %v404_v40 = vpop.f32.mrf.mxu1 }
 0x1b2   : > { %v405_v41 = vadd.f32 %v470_v39, %v404_v40 }
 0x1b3   : > { %v576_v42 = vpop.f32.mrf.mxu1 }
 0x1b4   : > { %408 = vst [vmem:[%s219_s26] sm:$0xff] %v405_v41 }
 0x1b5 PF: > { %s15_s18 = sadd.s32 1, %s593_s18  }
 0x1b6   : > { %p12_p4 = scmp.ge.s32.totalorder %s15_s18, 4  }
 0x1b8   :  { %14 = sbr.rel (!%p12_p4) target bundleno = 1 (0x1), region = 70 }

</bundles_post_ra>
